<compile_context>
chip_gen: v7x
topology: tpu7x:2x2x1
jax: 0.10.0
libtpu: 0.0.40
codegen_flags: <defaults>
</compile_context>

<pallas_src>
import functools

import jax
import jax.numpy as jnp
import numpy as np
from jax.experimental import pallas as pl
from jax.experimental.pallas import tpu as pltpu

_NEG_LARGE = -1e30


def _round_up(x, m):
    return (x + m - 1) // m * m


def _vmem_capacity_bytes():
    try:
        return int(pltpu.get_tpu_info().vmem_capacity_bytes)
    except Exception:
        return 128 * 1024 * 1024


def _gate_dtype():
    # bf16 transcendentals only pay off on chips with a bf16 VPU/EUP (v6e/v7x).
    try:
        kind = jax.devices()[0].device_kind.lower()
    except Exception:
        kind = ""
    for old in ("v2", "v3", "v4", "v5"):
        if old in kind:
            return jnp.float32
    return jnp.bfloat16


def _abmil_attn_kernel(x_ref, w1_ref, b1_ref, wab_ref, bab_ref, wc_ref,
                       m_ref, l_ref, acc_ref, *,
                       dim_hid, n_valid, n_pad, tn, gate_dtype):
    """Per-tile gated-attention logits + online softmax; writes per-split partials."""
    c = pl.program_id(0)                    # split index ("parallel")
    j = pl.program_id(1)                    # N-tile index within split ("arbitrary")
    steps = pl.num_programs(1)

    @pl.when(j == 0)
    def _init():
        m_ref[...] = jnp.full(m_ref.shape, _NEG_LARGE, m_ref.dtype)
        l_ref[...] = jnp.zeros(l_ref.shape, l_ref.dtype)
        acc_ref[...] = jnp.zeros(acc_ref.shape, acc_ref.dtype)

    x = x_ref[...]                                               # [TN, Din] bf16

    # attention_net first Linear + ReLU (Dropout = identity in eval mode).
    h = jnp.dot(x, w1_ref[...], preferred_element_type=jnp.float32) + b1_ref[...]
    h = jnp.maximum(h, 0.0)                                      # [TN, Dhid] f32
    h_bf = h.astype(jnp.bfloat16)

    # Attn_Net_Gated: fused [Wa || Wb] -> one MXU pass, then slice halves.
    ab = jnp.dot(h_bf, wab_ref[...],
                 preferred_element_type=jnp.float32) + bab_ref[...]
    ab = ab.astype(gate_dtype)                                   # bf16 on v6e/v7x
    a = jnp.tanh(ab[:, :dim_hid])
    b = jax.nn.sigmoid(ab[:, dim_hid:])
    gated = (a * b).astype(jnp.float32)                          # [TN, Dhid]
    # attention_c (Linear(Dhid, 1)) as a lane reduction; bc dropped (it is a
    # constant logit shift and cancels in the softmax).
    logits = jnp.sum(gated * wc_ref[...], axis=-1, keepdims=True)  # [TN, 1]

    def update(logits):
        # Online (flash-style) softmax over the instance axis.
        m_old = m_ref[0]                                         # [1, 1]
        m_new = jnp.maximum(m_old, jnp.max(logits, axis=0, keepdims=True))
        alpha = jnp.exp(m_old - m_new)                           # [1, 1]
        p = jnp.exp(logits - m_new)                              # [TN, 1]
        l_ref[0] = alpha * l_ref[0] + jnp.sum(p, axis=0, keepdims=True)
        # p^T @ h on the MXU (frees the VPU/XLU from a TN-deep reduction).
        pv = jax.lax.dot_general(p.astype(jnp.bfloat16), h_bf,
                                 (((0,), (0,)), ((), ())),
                                 preferred_element_type=jnp.float32)  # [1, Dhid]
        acc_ref[0] = alpha * acc_ref[0] + pv
        m_ref[0] = m_new

    if n_pad != n_valid:
        # Only tiles whose row range extends past n_valid need the mask.
        gstep = c * steps + j
        needs_mask = (gstep + 1) * tn > n_valid

        @pl.when(needs_mask)
        def _masked():
            rows = jax.lax.broadcasted_iota(jnp.int32, (tn, 1), 0) + gstep * tn
            update(jnp.where(rows < n_valid, logits, _NEG_LARGE))

        @pl.when(jnp.logical_not(needs_mask))
        def _clean():
            update(logits)
    else:
        update(logits)


def _abmil_combine_kernel(m_ref, l_ref, acc_ref, wr_ref, br_ref, out_ref):
    """Merge per-split online-softmax partials and apply rho (Linear + ReLU)."""
    s = m_ref.shape[0]
    m_g = m_ref[0]                                               # [1, 1]
    for i in range(1, s):
        m_g = jnp.maximum(m_g, m_ref[i])
    l_g = jnp.zeros_like(m_g)
    acc_g = jnp.zeros_like(acc_ref[0])                           # [1, Dhid]
    for i in range(s):
        scale = jnp.exp(m_ref[i] - m_g)                          # [1, 1]
        l_g = l_g + l_ref[i] * scale
        acc_g = acc_g + acc_ref[i] * scale
    hp = acc_g / l_g                                             # softmax(A) @ h
    H = jnp.dot(hp.astype(jnp.bfloat16), wr_ref[...],
                preferred_element_type=jnp.float32) + br_ref[...]
    out_ref[...] = jnp.maximum(H, 0.0)                           # [1, Dout]


def abmil_forward(x_path, params, *, block_n=None, num_splits=2):
    """x_path: [1, N, dim_in]  ->  H: [1, dim_out].

    block_n: instance-tile size (auto-sized from VMEM capacity if None).
    num_splits: number of independent N-partitions (2 uses both v7x cores via
    the leading "parallel" grid axis; on 1-TC chips it is just a short loop).
    """
    (w1, b1, wa, ba, wb, bb, wc, bc, wr, br) = params
    del bc  # constant logit shift: cancels in the softmax
    x = x_path[0]                                    # squeeze(0): [N, Din]
    n, dim_in = x.shape
    dim_hid = w1.shape[1]
    dim_out = wr.shape[1]

    vmem_cap = _vmem_capacity_bytes()
    vmem_limit = int(vmem_cap * 3 // 4)              # 96 MiB v5e/v6e, 48 MiB v7x
    if block_n is None:
        block_n = 2048 if vmem_cap >= (100 << 20) else 1024
        if dim_hid >= 512:
            block_n = max(256, block_n // 2)

    # Instance tile: multiple of 16 (bf16 sublane packing), never larger than
    # the (rounded) bag.
    tn = min(_round_up(block_n, 16), _round_up(n, 16))
    total_tiles = (n + tn - 1) // tn
    num_splits = max(1, min(num_splits, total_tiles))
    steps = (total_tiles + num_splits - 1) // num_splits
    n_pad = num_splits * steps * tn
    if n_pad != n:
        x = jnp.pad(x, ((0, n_pad - n), (0, 0)))

    # MXU operands in bf16 (f32 accumulation); biases / gating row stay f32.
    x_bf = x.astype(jnp.bfloat16)
    w1_bf = w1.astype(jnp.bfloat16)
    wab_bf = jnp.concatenate([wa, wb], axis=1).astype(jnp.bfloat16)  # [Dhid, 2*Dhid]
    bab = jnp.concatenate([ba, bb], axis=1)                          # [1, 2*Dhid]
    wr_bf = wr.astype(jnp.bfloat16)

    gate_dtype = _gate_dtype()
    kernel = functools.partial(_abmil_attn_kernel, dim_hid=dim_hid, n_valid=n,
                               n_pad=n_pad, tn=tn, gate_dtype=gate_dtype)

    const = lambda c, j: (0, 0)                      # VMEM-resident across steps
    part = lambda c, j: (c, 0, 0)                    # one partial block per split

    m_part, l_part, acc_part = pl.pallas_call(
        kernel,
        out_shape=(
            jax.ShapeDtypeStruct((num_splits, 1, 1), jnp.float32),        # m
            jax.ShapeDtypeStruct((num_splits, 1, 1), jnp.float32),        # l
            jax.ShapeDtypeStruct((num_splits, 1, dim_hid), jnp.float32),  # acc
        ),
        grid_spec=pltpu.PrefetchScalarGridSpec(
            num_scalar_prefetch=0,
            grid=(num_splits, steps),
            in_specs=[
                pl.BlockSpec((tn, dim_in), lambda c, j: (c * steps + j, 0)),  # x
                pl.BlockSpec((dim_in, dim_hid), const),                       # w1
                pl.BlockSpec((1, dim_hid), const),                            # b1
                pl.BlockSpec((dim_hid, 2 * dim_hid), const),                  # [Wa||Wb]
                pl.BlockSpec((1, 2 * dim_hid), const),                        # [ba||bb]
                pl.BlockSpec((1, dim_hid), const),                            # wc row
            ],
            out_specs=[
                pl.BlockSpec((1, 1, 1), part),
                pl.BlockSpec((1, 1, 1), part),
                pl.BlockSpec((1, 1, dim_hid), part),
            ],
        ),
        compiler_params=pltpu.CompilerParams(
            dimension_semantics=("parallel", "arbitrary"),
            vmem_limit_bytes=vmem_limit,
        ),
    )(x_bf, w1_bf, b1, wab_bf, bab, wc)

    # Tiny combine epilogue: merge split partials + rho (Linear + ReLU).
    return pl.pallas_call(
        _abmil_combine_kernel,
        out_shape=jax.ShapeDtypeStruct((1, dim_out), jnp.float32),
    )(m_part, l_part, acc_part, wr_bf, br)


def make_params(key, dim_in, dim_hid, dim_out):
    ks = jax.random.split(key, 10)
    scale = 0.1
    # weights stored already transposed: [in, out]; biases as [1, out]
    w1 = scale * jax.random.normal(ks[0], (dim_in, dim_hid), jnp.float32)
    b1 = scale * jax.random.normal(ks[1], (1, dim_hid), jnp.float32)
    wa = scale * jax.random.normal(ks[2], (dim_hid, dim_hid), jnp.float32)
    ba = scale * jax.random.normal(ks[3], (1, dim_hid), jnp.float32)
    wb = scale * jax.random.normal(ks[4], (dim_hid, dim_hid), jnp.float32)
    bb = scale * jax.random.normal(ks[5], (1, dim_hid), jnp.float32)
    wc = scale * jax.random.normal(ks[6], (1, dim_hid), jnp.float32)  # Linear(Dhid, 1) row
    bc = scale * jax.random.normal(ks[7], (1, 1), jnp.float32)
    wr = scale * jax.random.normal(ks[8], (dim_hid, dim_out), jnp.float32)
    br = scale * jax.random.normal(ks[9], (1, dim_out), jnp.float32)
    return (w1, b1, wa, ba, wb, bb, wc, bc, wr, br)


def abmil_reference(x_path, params):
    """Pure-JAX f32 reference mirroring the PyTorch forward (eval mode)."""
    (w1, b1, wa, ba, wb, bb, wc, bc, wr, br) = params
    x = x_path[0]
    h = jax.nn.relu(x @ w1 + b1)
    a = jnp.tanh(h @ wa + ba)
    b = jax.nn.sigmoid(h @ wb + bb)
    A = (a * b) @ wc.T + bc                               # [N, 1]
    A = jax.nn.softmax(A.T, axis=1)                       # [1, N]
    hp = A @ h                                            # [1, Dhid]
    return jax.nn.relu(hp @ wr + br)                      # [1, Dout]


if __name__ == "__main__":
    dim_in, dim_hid, dim_out = 64, 32, 16
    key = jax.random.PRNGKey(0)
    k1, k2, k3, k4, kp = jax.random.split(key, 5)
    params = make_params(kp, dim_in, dim_hid, dim_out)

    cases = [
        # N = 64, tile 16 -> 2 splits x 2 tiles; exercises the cross-tile
        # online softmax and the per-split partial combine (no padding).
        (jax.random.normal(k1, (1, 64, dim_in), jnp.float32), dict(block_n=16)),
        # Ragged bag N = 40 -> padded to 64; padding spans two tiles of the
        # second split (one partially-masked, one fully-padded).
        (jax.random.normal(k2, (1, 40, dim_in), jnp.float32), dict(block_n=16)),
        # Tiny bag N = 8 -> single tile, single split, masked padding.
        (jax.random.normal(k3, (1, 8, dim_in), jnp.float32), dict(block_n=16)),
        # Default (auto) tile sizing path.
        (jax.random.normal(k4, (1, 300, dim_in), jnp.float32), dict()),
    ]
    for x_path, kw in cases:
        out = jax.block_until_ready(abmil_forward(x_path, params, **kw))
        ref = abmil_reference(x_path, params)
        np.testing.assert_allclose(np.asarray(out), np.asarray(ref),
                                   rtol=3e-2, atol=3e-2)

    print("KERNEL_OK")
</pallas_src>

<mosaic_0001>
module attributes {stable_mosaic.version = 11 : i64} {
  func.func @_abmil_attn_kernel(%arg0: i32, %arg1: i32, %arg2: memref<16x64xbf16, #tpu.memory_space<vmem>>, %arg3: memref<64x32xbf16, #tpu.memory_space<vmem>>, %arg4: memref<1x32xf32, #tpu.memory_space<vmem>>, %arg5: memref<32x64xbf16, #tpu.memory_space<vmem>>, %arg6: memref<1x64xf32, #tpu.memory_space<vmem>>, %arg7: memref<1x32xf32, #tpu.memory_space<vmem>>, %arg8: memref<1x1x1xf32, #tpu.memory_space<vmem>>, %arg9: memref<1x1x1xf32, #tpu.memory_space<vmem>>, %arg10: memref<1x1x32xf32, #tpu.memory_space<vmem>>) attributes {dimension_semantics = [#tpu.dimension_semantics<parallel>, #tpu.dimension_semantics<arbitrary>], iteration_bounds = array<i64: 2, 2>, scalar_prefetch = 0 : i64, scratch_operands = 0 : i64, tpu.core_type = #tpu.core_type<tc>, window_params = [{transform_indices = @transform_0, window_bounds = array<i64: 16, 64>}, {pipeline_mode = #tpu.pipeline_mode<synchronous>, transform_indices = @transform_1, window_bounds = array<i64: 64, 32>}, {pipeline_mode = #tpu.pipeline_mode<synchronous>, transform_indices = @transform_2, window_bounds = array<i64: 1, 32>}, {pipeline_mode = #tpu.pipeline_mode<synchronous>, transform_indices = @transform_3, window_bounds = array<i64: 32, 64>}, {pipeline_mode = #tpu.pipeline_mode<synchronous>, transform_indices = @transform_4, window_bounds = array<i64: 1, 64>}, {pipeline_mode = #tpu.pipeline_mode<synchronous>, transform_indices = @transform_5, window_bounds = array<i64: 1, 32>}, {transform_indices = @transform_6, window_bounds = array<i64: 1, 1, 1>}, {transform_indices = @transform_7, window_bounds = array<i64: 1, 1, 1>}, {transform_indices = @transform_8, window_bounds = array<i64: 1, 1, 32>}]} {
    %c0_i32 = arith.constant 0 : i32
    %0 = arith.cmpi eq, %arg1, %c0_i32 : i32
    %1 = arith.extui %0 : i1 to i32
    %c0_i32_0 = arith.constant 0 : i32
    %2 = arith.cmpi ne, %1, %c0_i32_0 : i32
    scf.if %2 {
      %cst_37 = arith.constant -1.000000e+30 : f32
      %65 = vector.broadcast %cst_37 : f32 to vector<1x1x1xf32>
      %c0_38 = arith.constant 0 : index
      %c0_39 = arith.constant 0 : index
      %c0_40 = arith.constant 0 : index
      %66 = vector.load %arg8[%c0_38, %c0_39, %c0_40] : memref<1x1x1xf32, #tpu.memory_space<vmem>>, vector<1x1x1xf32>
      tpu.vector_store %arg8[%c0_38, %c0_39, %c0_40], %65 {strides = array<i32>} : memref<1x1x1xf32, #tpu.memory_space<vmem>>, vector<1x1x1xf32>,
      %cst_41 = arith.constant 0.000000e+00 : f32
      %67 = vector.broadcast %cst_41 : f32 to vector<1x1x1xf32>
      %c0_42 = arith.constant 0 : index
      %c0_43 = arith.constant 0 : index
      %c0_44 = arith.constant 0 : index
      %68 = vector.load %arg9[%c0_42, %c0_43, %c0_44] : memref<1x1x1xf32, #tpu.memory_space<vmem>>, vector<1x1x1xf32>
      tpu.vector_store %arg9[%c0_42, %c0_43, %c0_44], %67 {strides = array<i32>} : memref<1x1x1xf32, #tpu.memory_space<vmem>>, vector<1x1x1xf32>,
      %cst_45 = arith.constant 0.000000e+00 : f32
      %69 = vector.broadcast %cst_45 : f32 to vector<1x1x32xf32>
      %c0_46 = arith.constant 0 : index
      %c0_47 = arith.constant 0 : index
      %c0_48 = arith.constant 0 : index
      %70 = vector.load %arg10[%c0_46, %c0_47, %c0_48] : memref<1x1x32xf32, #tpu.memory_space<vmem>>, vector<1x1x32xf32>
      tpu.vector_store %arg10[%c0_46, %c0_47, %c0_48], %69 {strides = array<i32>} : memref<1x1x32xf32, #tpu.memory_space<vmem>>, vector<1x1x32xf32>,
    } else {
    }
    %c0 = arith.constant 0 : index
    %c0_1 = arith.constant 0 : index
    %3 = vector.load %arg2[%c0, %c0_1] : memref<16x64xbf16, #tpu.memory_space<vmem>>, vector<16x64xbf16>
    %c0_2 = arith.constant 0 : index
    %c0_3 = arith.constant 0 : index
    %4 = vector.load %arg3[%c0_2, %c0_3] : memref<64x32xbf16, #tpu.memory_space<vmem>>, vector<64x32xbf16>
    %cst = arith.constant dense<0.000000e+00> : vector<16x32xf32>
    %5 = tpu.matmul %3, %4, %cst {dimension_numbers = #tpu.dot_dimension_numbers<[1], [0], [0], [1], [0, 0, 1, 1], [], []>} : vector<16x64xbf16>, vector<64x32xbf16>, vector<16x32xf32> -> vector<16x32xf32>
    %c0_4 = arith.constant 0 : index
    %c0_5 = arith.constant 0 : index
    %6 = vector.load %arg4[%c0_4, %c0_5] : memref<1x32xf32, #tpu.memory_space<vmem>>, vector<1x32xf32>
    %7 = vector.broadcast %6 : vector<1x32xf32> to vector<16x32xf32>
    %8 = arith.addf %5, %7 : vector<16x32xf32>
    %cst_6 = arith.constant 0.000000e+00 : f32
    %9 = vector.broadcast %cst_6 : f32 to vector<16x32xf32>
    %10 = arith.maximumf %8, %9 : vector<16x32xf32>
    %11 = arith.truncf %10 : vector<16x32xf32> to vector<16x32xbf16>
    %c0_7 = arith.constant 0 : index
    %c0_8 = arith.constant 0 : index
    %12 = vector.load %arg5[%c0_7, %c0_8] : memref<32x64xbf16, #tpu.memory_space<vmem>>, vector<32x64xbf16>
    %cst_9 = arith.constant dense<0.000000e+00> : vector<16x64xf32>
    %13 = tpu.matmul %11, %12, %cst_9 {dimension_numbers = #tpu.dot_dimension_numbers<[1], [0], [0], [1], [0, 0, 1, 1], [], []>} : vector<16x32xbf16>, vector<32x64xbf16>, vector<16x64xf32> -> vector<16x64xf32>
    %c0_10 = arith.constant 0 : index
    %c0_11 = arith.constant 0 : index
    %14 = vector.load %arg6[%c0_10, %c0_11] : memref<1x64xf32, #tpu.memory_space<vmem>>, vector<1x64xf32>
    %15 = vector.broadcast %14 : vector<1x64xf32> to vector<16x64xf32>
    %16 = arith.addf %13, %15 : vector<16x64xf32>
    %17 = arith.truncf %16 : vector<16x64xf32> to vector<16x64xbf16>
    %18 = vector.extract_strided_slice %17 {offsets = [0, 0], sizes = [16, 32], strides = [1, 1]} : vector<16x64xbf16> to vector<16x32xbf16>
    %19 = math.tanh %18 : vector<16x32xbf16>
    %20 = vector.extract_strided_slice %17 {offsets = [0, 32], sizes = [16, 32], strides = [1, 1]} : vector<16x64xbf16> to vector<16x32xbf16>
    %21 = arith.negf %20 : vector<16x32xbf16>
    %22 = math.exp %21 : vector<16x32xbf16>
    %cst_12 = arith.constant 1.000000e+00 : bf16
    %23 = vector.broadcast %cst_12 : bf16 to vector<16x32xbf16>
    %24 = arith.addf %23, %22 : vector<16x32xbf16>
    %25 = arith.divf %23, %24 : vector<16x32xbf16>
    %26 = arith.mulf %19, %25 : vector<16x32xbf16>
    %27 = arith.extf %26 : vector<16x32xbf16> to vector<16x32xf32>
    %c0_13 = arith.constant 0 : index
    %c0_14 = arith.constant 0 : index
    %28 = vector.load %arg7[%c0_13, %c0_14] : memref<1x32xf32, #tpu.memory_space<vmem>>, vector<1x32xf32>
    %29 = vector.broadcast %28 : vector<1x32xf32> to vector<16x32xf32>
    %30 = arith.mulf %27, %29 : vector<16x32xf32>
    %cst_15 = arith.constant dense<0.000000e+00> : vector<16xf32>
    %31 = vector.multi_reduction <add>, %30, %cst_15 [1] : vector<16x32xf32> to vector<16xf32>
    %32 = vector.shape_cast %31 : vector<16xf32> to vector<16x1xf32>
    %c0_16 = arith.constant 0 : index
    %c0_17 = arith.constant 0 : index
    %c0_18 = arith.constant 0 : index
    %33 = vector.load %arg8[%c0_16, %c0_17, %c0_18] : memref<1x1x1xf32, #tpu.memory_space<vmem>>, vector<1x1x1xf32>
    %34 = vector.shape_cast %33 : vector<1x1x1xf32> to vector<1x1xf32>
    %cst_19 = arith.constant dense<0xFF800000> : vector<1xf32>
    %35 = vector.multi_reduction <maximumf>, %32, %cst_19 [0] : vector<16x1xf32> to vector<1xf32>
    %36 = vector.shape_cast %35 : vector<1xf32> to vector<1x1xf32>
    %37 = arith.maximumf %34, %36 : vector<1x1xf32>
    %38 = arith.subf %34, %37 : vector<1x1xf32>
    %39 = math.exp %38 : vector<1x1xf32>
    %40 = vector.broadcast %37 : vector<1x1xf32> to vector<16x1xf32>
    %41 = arith.subf %32, %40 : vector<16x1xf32>
    %42 = math.exp %41 : vector<16x1xf32>
    %c0_20 = arith.constant 0 : index
    %c0_21 = arith.constant 0 : index
    %c0_22 = arith.constant 0 : index
    %43 = vector.load %arg9[%c0_20, %c0_21, %c0_22] : memref<1x1x1xf32, #tpu.memory_space<vmem>>, vector<1x1x1xf32>
    %44 = vector.shape_cast %43 : vector<1x1x1xf32> to vector<1x1xf32>
    %45 = arith.mulf %39, %44 : vector<1x1xf32>
    %cst_23 = arith.constant dense<0.000000e+00> : vector<1xf32>
    %46 = vector.multi_reduction <add>, %42, %cst_23 [0] : vector<16x1xf32> to vector<1xf32>
    %47 = vector.shape_cast %46 : vector<1xf32> to vector<1x1xf32>
    %48 = arith.addf %45, %47 : vector<1x1xf32>
    %c0_24 = arith.constant 0 : index
    %c0_25 = arith.constant 0 : index
    %c0_26 = arith.constant 0 : index
    %49 = vector.load %arg9[%c0_24, %c0_25, %c0_26] : memref<1x1x1xf32, #tpu.memory_space<vmem>>, vector<1x1x1xf32>
    %50 = vector.shape_cast %49 : vector<1x1x1xf32> to vector<1x1xf32>
    %51 = vector.shape_cast %48 : vector<1x1xf32> to vector<1x1x1xf32>
    tpu.vector_store %arg9[%c0_24, %c0_25, %c0_26], %51 {strides = array<i32>} : memref<1x1x1xf32, #tpu.memory_space<vmem>>, vector<1x1x1xf32>,
    %52 = arith.truncf %42 : vector<16x1xf32> to vector<16x1xbf16>
    %cst_27 = arith.constant dense<0.000000e+00> : vector<1x32xf32>
    %53 = tpu.matmul %52, %11, %cst_27 {dimension_numbers = #tpu.dot_dimension_numbers<[0], [0], [1], [1], [0, 1, 1, 1], [], []>} : vector<16x1xbf16>, vector<16x32xbf16>, vector<1x32xf32> -> vector<1x32xf32>
    %c0_28 = arith.constant 0 : index
    %c0_29 = arith.constant 0 : index
    %c0_30 = arith.constant 0 : index
    %54 = vector.load %arg10[%c0_28, %c0_29, %c0_30] : memref<1x1x32xf32, #tpu.memory_space<vmem>>, vector<1x1x32xf32>
    %55 = vector.shape_cast %54 : vector<1x1x32xf32> to vector<1x32xf32>
    %56 = vector.broadcast %39 : vector<1x1xf32> to vector<1x32xf32>
    %57 = arith.mulf %56, %55 : vector<1x32xf32>
    %58 = arith.addf %57, %53 : vector<1x32xf32>
    %c0_31 = arith.constant 0 : index
    %c0_32 = arith.constant 0 : index
    %c0_33 = arith.constant 0 : index
    %59 = vector.load %arg10[%c0_31, %c0_32, %c0_33] : memref<1x1x32xf32, #tpu.memory_space<vmem>>, vector<1x1x32xf32>
    %60 = vector.shape_cast %59 : vector<1x1x32xf32> to vector<1x32xf32>
    %61 = vector.shape_cast %58 : vector<1x32xf32> to vector<1x1x32xf32>
    tpu.vector_store %arg10[%c0_31, %c0_32, %c0_33], %61 {strides = array<i32>} : memref<1x1x32xf32, #tpu.memory_space<vmem>>, vector<1x1x32xf32>,
    %c0_34 = arith.constant 0 : index
    %c0_35 = arith.constant 0 : index
    %c0_36 = arith.constant 0 : index
    %62 = vector.load %arg8[%c0_34, %c0_35, %c0_36] : memref<1x1x1xf32, #tpu.memory_space<vmem>>, vector<1x1x1xf32>
    %63 = vector.shape_cast %62 : vector<1x1x1xf32> to vector<1x1xf32>
    %64 = vector.shape_cast %37 : vector<1x1xf32> to vector<1x1x1xf32>
    tpu.vector_store %arg8[%c0_34, %c0_35, %c0_36], %64 {strides = array<i32>} : memref<1x1x1xf32, #tpu.memory_space<vmem>>, vector<1x1x1xf32>,
    return
  }
  func.func @transform_0(%arg0: i32, %arg1: i32) -> (i32, i32) {
    %c2_i32 = arith.constant 2 : i32
    %0 = arith.muli %arg0, %c2_i32 : i32
    %1 = arith.addi %0, %arg1 : i32
    %c0_i32 = arith.constant 0 : i32
    %c0_i32_0 = arith.constant 0 : i32
    return %1, %c0_i32 : i32, i32
  }
  func.func @transform_1(%arg0: i32, %arg1: i32) -> (i32, i32) {
    %c0_i32 = arith.constant 0 : i32
    %c0_i32_0 = arith.constant 0 : i32
    %c0_i32_1 = arith.constant 0 : i32
    return %c0_i32, %c0_i32_0 : i32, i32
  }
  func.func @transform_2(%arg0: i32, %arg1: i32) -> (i32, i32) {
    %c0_i32 = arith.constant 0 : i32
    %c0_i32_0 = arith.constant 0 : i32
    %c0_i32_1 = arith.constant 0 : i32
    return %c0_i32, %c0_i32_0 : i32, i32
  }
  func.func @transform_3(%arg0: i32, %arg1: i32) -> (i32, i32) {
    %c0_i32 = arith.constant 0 : i32
    %c0_i32_0 = arith.constant 0 : i32
    %c0_i32_1 = arith.constant 0 : i32
    return %c0_i32, %c0_i32_0 : i32, i32
  }
  func.func @transform_4(%arg0: i32, %arg1: i32) -> (i32, i32) {
    %c0_i32 = arith.constant 0 : i32
    %c0_i32_0 = arith.constant 0 : i32
    %c0_i32_1 = arith.constant 0 : i32
    return %c0_i32, %c0_i32_0 : i32, i32
  }
  func.func @transform_5(%arg0: i32, %arg1: i32) -> (i32, i32) {
    %c0_i32 = arith.constant 0 : i32
    %c0_i32_0 = arith.constant 0 : i32
    %c0_i32_1 = arith.constant 0 : i32
    return %c0_i32, %c0_i32_0 : i32, i32
  }
  func.func @transform_6(%arg0: i32, %arg1: i32) -> (i32, i32, i32) {
    %c0_i32 = arith.constant 0 : i32
    %c0_i32_0 = arith.constant 0 : i32
    %c0_i32_1 = arith.constant 0 : i32
    return %arg0, %c0_i32, %c0_i32_0 : i32, i32, i32
  }
  func.func @transform_7(%arg0: i32, %arg1: i32) -> (i32, i32, i32) {
    %c0_i32 = arith.constant 0 : i32
    %c0_i32_0 = arith.constant 0 : i32
    %c0_i32_1 = arith.constant 0 : i32
    return %arg0, %c0_i32, %c0_i32_0 : i32, i32, i32
  }
  func.func @transform_8(%arg0: i32, %arg1: i32) -> (i32, i32, i32) {
    %c0_i32 = arith.constant 0 : i32
    %c0_i32_0 = arith.constant 0 : i32
    %c0_i32_1 = arith.constant 0 : i32
    return %arg0, %c0_i32, %c0_i32_0 : i32, i32, i32
  }
}

</mosaic_0001>

<bundles_post_ra>
// kernel: tpu_custom_call.1
= control target key start
LH: loop header
LB: loop body
LE: loop exit
PB: predicated region body
PF: predicated region fallthrough
CT: control target
= control target key end

     0   :  { %s2169_s0 = inlined_call_operand.hbm [shape: bf16[64,64], index: 0, kind: input, shape index: {}]   ;;  %s2170_s1 = inlined_call_operand.hbm [shape: bf16[64,32], index: 1, kind: input, shape index: {}]   ;;  %s2171_s2 = inlined_call_operand.hbm [shape: f32[1,32], index: 2, kind: input, shape index: {}]   ;;  %s2172_s3 = inlined_call_operand.hbm [shape: bf16[32,64], index: 3, kind: input, shape index: {}]   ;;  %s2173_s4 = inlined_call_operand.hbm [shape: f32[1,64], index: 4, kind: input, shape index: {}]   ;;  %s2174_s5 = inlined_call_operand.hbm [shape: f32[1,32], index: 5, kind: input, shape index: {}]   ;;  %s2175_s6 = inlined_call_operand.hbm [shape: f32[2,1,1], index: 6, kind: output, shape index: {0}]   ;;  %s2176_s7 = inlined_call_operand.hbm [shape: f32[2,1,1], index: 7, kind: output, shape index: {1}]   ;;  %s2177_s8 = inlined_call_operand.hbm [shape: f32[2,1,32], index: 8, kind: output, shape index: {2}]  }
   0x1   :  { %2191 = sst [smem:[#allocation27_spill]] %s2169_s0 }
   0x2   :  { %2192 = sst [smem:[#allocation28_spill]] %s2170_s1 }
   0x3   :  { %2193 = sst [smem:[#allocation29_spill]] %s2171_s2 }
   0x4   :  { %2194 = sst [smem:[#allocation30_spill]] %s2172_s3 }
   0x5   :  { %2195 = sst [smem:[#allocation31_spill]] %s2173_s4 }
   0x6   :  { %2196 = sst [smem:[#allocation32_spill]] %s2174_s5 }
   0x7   :  { %2197 = sst [smem:[#allocation33_spill]] %s2175_s6 }
   0x8   :  { %2198 = sst [smem:[#allocation34_spill]] %s2176_s7 }
   0x9   :  { %2199 = sst [smem:[#allocation35_spill]] %s2177_s8 }
   0xa   :  { %14 = vsyncpa [#allocation3], 0 }
   0xb   :  { %16 = vsyncpa [#allocation3 + $0x1], 0 }
   0xc   :  { %17 = vsyncpa [#allocation6], 0 }
   0xd   :  { %18 = vsyncpa [#allocation9], 0 }
   0xe   :  { %19 = vsyncpa [#allocation12], 0 }
   0xf   :  { %20 = vsyncpa [#allocation4], 0 }
  0x10   :  { %22 = vsyncpa [#allocation4 + $0x1], 0 }
  0x11   :  { %23 = vsyncpa [#allocation15], 0 }
  0x12   :  { %25 = vsyncpa [#allocation15 + $0x1], 0  ;;  %s1671_s27 = smov 0   ;;  %s1673_s28 = smov 0  }
  0x13   :  { %s1675_s29 = smov 0   ;;  %s1677_s30 = smov 0  }
  0x14   :  { %s1679_s9 = smov 0   ;;  %s1681_s10 = smov 0  }
  0x15   :  { %s1683_s11 = smov 0   ;;  %s1685_s12 = smov 0  }
  0x16   :  { %s1687_s13 = smov 0   ;;  %s1689_s14 = smov 0  }
  0x17   :  { %s1691_s15 = smov 0  }
  0x18 LB: > { %2200 = sst [smem:[#allocation23_spill]] %s1591_s11  ;;  %s1727_s16 = sadd.s32 4294967295, %s1607_s15   ;;  %s1607_s15 = sphi %s1691_s15, %s31_s15   ;;  %s1603_s14 = sphi %s1689_s14, %s2250_s14   ;;  %s1599_s13 = sphi %s1687_s13, %s2249_s13   ;;  %s1595_s12 = sphi %s1685_s12, %s2248_s12   ;;  %s1591_s11 = sphi %s1683_s11, %s2247_s11   ;;  %s1587_s10 = sphi %s1681_s10, %s2246_s10   ;;  %s1583_s9 = sphi %s1679_s9, %s2245_s9   ;;  %s1579_s30 = sphi %s1677_s30, %s2244_s30   ;;  %s1575_s29 = sphi %s1675_s29, %s2243_s29   ;;  %s1571_s28 = sphi %s1673_s28, %s2242_s28   ;;  %s1567_s27 = sphi %s1671_s27, %s2241_s27  }
  0x19   : > { %2201 = sst [smem:[#allocation24_spill]] %s1595_s12  ;;  %p977_p0 = scmp.ge.s32.totalorder %s1607_s15, 1 }
  0x1a   : > { %p2183_p1 = scmp.eq.s32.totalorder %s1727_s16, 0  ;;  %p261_p3 = scmp.lt.s32.totalorder %s1607_s15, 5 }
  0x1b   : > { %s1609_s18 = smov [#allocation5]   ;;  %s1610_s21 = smov [#allocation8]  }
  0x1c   : > { %p1733_p4 = pnand %p977_p0, %p261_p3  ;;  %s273_s19 = sshll.u32 %s1609_s18, 4  ;;  %s1737_s19 = int_to_ptr.vmem [resolvable:$true] %s273_s19 }
  0x1d   : > { %s297_s22 = sshll.u32 %s1610_s21, 4  ;;  %s1611_s23 = smov [#allocation7]   ;;  %s1747_s22 = int_to_ptr.vmem [resolvable:$true] %s297_s22 }
  0x1e   : > { %s2202_s17 = scalar_select %p1733_p4, 1, 0 }
  0x1f   : > { %p1080_p5 = pneg %p1733_p4  ;;  %s287_s24 = sshll.u32 %s1611_s23, 4  ;;  %s1749_s24 = int_to_ptr.vmem [resolvable:$true] %s287_s24 }
  0x20   : > { %2203 = sst [smem:[#allocation25_spill]] %s2202_s17  ;;  %s2205_s1 = sld [smem:[#allocation28_spill]] }
  0x21   : > { %p1743_p6 = pnand %p1080_p5, %p2183_p1 }
  0x23   : > { %p1759_p8 = pneg %p1743_p6 }
  0x26   : > { %s1243_s18 = scalar_lea.hbm %s2205_s1, 512 }
  0x27   : > { %p1244_p7 = scmp.ne.s32.totalorder %s2205_s1, %s1243_s18  ;;  %p1250_p11 = scmp.lt.u32.totalorder %s1243_s18, %s2205_s1 }
  0x29   : > { %p1246_p9 = pnand %p1759_p8, %p1244_p7 }
  0x2b   : > { %p1247_p10 = pneg %p1246_p9 }
  0x2d   : > { %p1252_p12 = pnand %p1250_p11, %p1247_p10 }
  0x2f   : > { %1255 = shalt.err (!%p1252_p12)
}
  0x30   : > { %s1256_s6 = scalar_lea.vmem %s1737_s19, 512  ;;  %p1264_p5 = scmp.lt.s32.totalorder %s1737_s19, %s1737_s19 }
  0x31   : > { %p1257_p13 = scmp.ne.s32.totalorder %s1737_s19, %s1256_s6  ;;  %p1265_p2 = scmp.lt.s32.totalorder %s1256_s6, %s1256_s6 }
  0x33   : > { %p1259_p0 = pnand %p1257_p13, %p1759_p8  ;;  %p1266_p7 = por %p1265_p2, %p1264_p5 }
  0x35   : > { %p1260_p3 = pneg %p1259_p0 }
  0x37   : > { %p1267_p9 = pnand %p1266_p7, %p1260_p3 }
  0x39   : > { %1270 = shalt.err (!%p1267_p9)
}
  0x3a   : > { %s2185_s8 = smov 64   ;;  %s2186_s25 = smov 4  }
  0x3b   : > { %1083 = dma.hbm_to_vmem [thread:$0]  (!%p1743_p6), %s2205_s1, 512, %s1737_s19, [#allocation6], %s2185_s8, %s2185_s8, %s2186_s25  }
  0x3c   : > { %s2207_s3 = sld [smem:[#allocation30_spill]] }
  0x42   : > { %s1271_s6 = scalar_lea.hbm %s2207_s3, 256 }
  0x43   : > { %p1272_p2 = scmp.ne.s32.totalorder %s2207_s3, %s1271_s6  ;;  %p1278_p12 = scmp.lt.u32.totalorder %s1271_s6, %s2207_s3 }
  0x45   : > { %p1274_p10 = pnand %p1272_p2, %p1759_p8 }
  0x47   : > { %p1275_p11 = pneg %p1274_p10 }
  0x49   : > { %p1280_p13 = pnand %p1278_p12, %p1275_p11 }
  0x4b   : > { %1283 = shalt.err (!%p1280_p13)
}
  0x4c   : > { %s1284_s19 = scalar_lea.vmem %s1747_s22, 256  ;;  %p1292_p7 = scmp.lt.s32.totalorder %s1747_s22, %s1747_s22 }
  0x4d   : > { %p1285_p0 = scmp.ne.s32.totalorder %s1747_s22, %s1284_s19  ;;  %p1293_p9 = scmp.lt.s32.totalorder %s1284_s19, %s1284_s19 }
  0x4f   : > { %p1287_p3 = pnand %p1285_p0, %p1759_p8  ;;  %p1294_p2 = por %p1293_p9, %p1292_p7 }
  0x51   : > { %p1288_p5 = pneg %p1287_p3 }
  0x53   : > { %p1295_p10 = pnand %p1294_p2, %p1288_p5 }
  0x55   : > { %1298 = shalt.err (!%p1295_p10)
}
  0x56   : > { %1089 = dma.hbm_to_vmem [thread:$0]  (!%p1743_p6), %s2207_s3, 256, %s1747_s22, [#allocation9], %s2185_s8, %s2185_s8, %s2186_s25  }
  0x57   : > { %s2208_s2 = sld [smem:[#allocation29_spill]] }
  0x5d   : > { %s1299_s26 = scalar_lea.hbm %s2208_s2, 16 }
  0x5e   : > { %p1300_p11 = scmp.ne.s32.totalorder %s2208_s2, %s1299_s26  ;;  %p1306_p0 = scmp.lt.u32.totalorder %s1299_s26, %s2208_s2 }
  0x60   : > { %p1302_p12 = pnand %p1300_p11, %p1759_p8 }
  0x62   : > { %p1303_p13 = pneg %p1302_p12 }
  0x64   : > { %p1308_p3 = pnand %p1306_p0, %p1303_p13 }
  0x66   : > { %1311 = shalt.err (!%p1308_p3)
}
  0x67   : > { %s1312_s22 = scalar_lea.vmem %s1749_s24, 16  ;;  %s1319_s19 = scalar_lea.vmem %s1749_s24, 32 }
  0x68   : > { %p1313_p5 = scmp.ne.s32.totalorder %s1749_s24, %s1312_s22  ;;  %p1320_p2 = scmp.lt.s32.totalorder %s1749_s24, %s1749_s24 }
  0x69   : > { %p1321_p10 = scmp.lt.s32.totalorder %s1319_s19, %s1312_s22 }
  0x6a   : > { %p1315_p7 = pnand %p1313_p5, %p1759_p8 }
  0x6b   : > { %p1322_p11 = por %p1321_p10, %p1320_p2 }
  0x6c   : > { %p1316_p9 = pneg %p1315_p7 }
  0x6e   : > { %p1323_p12 = pnand %p1322_p11, %p1316_p9 }
  0x70   : > { %1326 = shalt.err (!%p1323_p12)
}
  0x71   : > { %1086 = dma.hbm_to_vmem [thread:$0]  (!%p1743_p6), %s2208_s2, 16, %s1749_s24, [#allocation6]  }
  0x72   : > { %s1614_s12 = smov [#allocation10]   ;;  %s1615_s26 = smov [#allocation11]  }
  0x73   : > { %s311_s17 = sshll.u32 %s1614_s12, 4  ;;  %s322_s18 = sshll.u32 %s1615_s26, 4  ;;  %s312_s17 = int_to_ptr.vmem [resolvable:$true] %s311_s17  ;;  %s1833_s18 = int_to_ptr.vmem [resolvable:$true] %s322_s18 }
  0x74   : > { %s2209_s4 = sld [smem:[#allocation31_spill]] }
  0x7a   : > { %s1327_s6 = scalar_lea.hbm %s2209_s4, 16 }
  0x7b   : > { %p1328_p13 = scmp.ne.s32.totalorder %s2209_s4, %s1327_s6  ;;  %p1334_p5 = scmp.lt.u32.totalorder %s1327_s6, %s2209_s4 }
  0x7d   : > { %p1330_p0 = pnand %p1328_p13, %p1759_p8 }
  0x7f   : > { %p1331_p3 = pneg %p1330_p0 }
  0x81   : > { %p1336_p7 = pnand %p1334_p5, %p1331_p3 }
  0x83   : > { %1339 = shalt.err (!%p1336_p7)
}
  0x84   : > { %s1340_s11 = scalar_lea.vmem %s312_s17, 16  ;;  %s1347_s12 = scalar_lea.vmem %s312_s17, 32 }
  0x85   : > { %p1341_p9 = scmp.ne.s32.totalorder %s312_s17, %s1340_s11  ;;  %p1348_p11 = scmp.lt.s32.totalorder %s312_s17, %s312_s17 }
  0x86   : > { %p1349_p12 = scmp.lt.s32.totalorder %s1347_s12, %s1340_s11 }
  0x87   : > { %p1343_p2 = pnand %p1341_p9, %p1759_p8 }
  0x88   : > { %p1350_p1 = por %p1349_p12, %p1348_p11 }
  0x89   : > { %p1344_p10 = pneg %p1343_p2 }
  0x8b   : > { %p1351_p4 = pnand %p1350_p1, %p1344_p10 }
  0x8d   : > { %1354 = shalt.err (!%p1351_p4)
}
  0x8e   : > { %1092 = dma.hbm_to_vmem [thread:$0]  (!%p1743_p6), %s2209_s4, 16, %s312_s17, [#allocation9]  }
  0x8f   : > { %s2210_s5 = sld [smem:[#allocation32_spill]] }
  0x95   : > { %s1355_s22 = scalar_lea.hbm %s2210_s5, 16 }
  0x96   : > { %p1356_p13 = scmp.ne.s32.totalorder %s2210_s5, %s1355_s22  ;;  %p1362_p1 = scmp.lt.u32.totalorder %s1355_s22, %s2210_s5 }
  0x98   : > { %p1358_p0 = pnand %p1356_p13, %p1759_p8 }
  0x9a   : > { %p1359_p3 = pneg %p1358_p0 }
  0x9c   : > { %p1364_p4 = pnand %p1362_p1, %p1359_p3 }
  0x9e   : > { %1367 = shalt.err (!%p1364_p4)
}
  0x9f   : > { %s1368_s17 = scalar_lea.vmem %s1833_s18, 16  ;;  %s1375_s12 = scalar_lea.vmem %s1833_s18, 32 }
  0xa0   : > { %p1369_p5 = scmp.ne.s32.totalorder %s1833_s18, %s1368_s17  ;;  %p1376_p2 = scmp.lt.s32.totalorder %s1833_s18, %s1833_s18 }
  0xa1   : > { %p1377_p10 = scmp.lt.s32.totalorder %s1375_s12, %s1368_s17 }
  0xa2   : > { %p1371_p7 = pnand %p1369_p5, %p1759_p8 }
  0xa3   : > { %p1378_p11 = por %p1377_p10, %p1376_p2 }
  0xa4   : > { %p1372_p9 = pneg %p1371_p7 }
  0xa6   : > { %p1379_p12 = pnand %p1378_p11, %p1372_p9 }
  0xa8   : > { %1382 = shalt.err (!%p1379_p12)
}
  0xa9   : > { %1095 = dma.hbm_to_vmem [thread:$0]  (!%p1743_p6), %s2210_s5, 16, %s1833_s18, [#allocation12]  }
  0xaa   : > { %s2187_s7 = sadd.s32 4294967294, %s1607_s15   ;;  %s40_s20 = sadd.s32 1, %s1599_s13 }
  0xab   : > { %p41_p8 = scmp.ge.s32.totalorder %s40_s20, 2  ;;  %s43_s23 = sadd.s32 1, %s1603_s14 }
  0xac   : > { %s975_s6 = sshll.u32 %s1603_s14, 1  ;;  %s54_s22 = sadd.s32 1, %s1587_s10 }
  0xad   : > { %s2252_s20 = smov (%p41_p8, %s40_s20), 0  ;;  %s2254_s23 = smov (!%p41_p8, %s43_s23), %s1603_s14 }
  0xae   : > { %s48_s19 = sadd.s32 %s1599_s13, %s975_s6  ;;  %p61_p13 = scmp.ne.s32.totalorder %s1587_s10, %s1583_s9 }
  0xaf   : > { %p45_p6 = scmp.ge.s32.totalorder %s2254_s23, 2  ;;  %p62_p0 = scmp.eq.s32.totalorder %s1607_s15, 0 }
  0xb0   : > { %p67_p3 = scmp.ne.s32.totalorder %s1583_s9, %s1579_s30  ;;  %s185_s18 = sadd.s32 1, %s1575_s29 }
  0xb1   : > { %s2256_s23 = smov (%p45_p6, %s2254_s23), 0  ;;  %p1894_p1 = por %p62_p0, %p61_p13 }
  0xb2   : > { %2211 = sst [smem:[#allocation26_spill]] %s2256_s23  ;;  %p2213_p4 = scmp.eq.s32.totalorder %s1727_s16, 0 }
  0xb3   : > { %s976_s11 = sshll.u32 %s2256_s23, 1  ;;  %s182_s17 = ssub.s32 %s1603_s14, %s2256_s23 }
  0xb4   : > { %p1900_p5 = por %p2213_p4, %p67_p3  ;;  %s50_s30 = sadd.s32 %s976_s11, %s2252_s20 }
  0xb5   : > { %p183_p7 = scmp.eq.s32.totalorder %s182_s17, 0  ;;  %s51_s12 = ssub.s32 %s48_s19, %s50_s30 }
  0xb6   : > { %p195_p9 = scmp.ne.s32.totalorder %s1575_s29, %s1571_s28  ;;  %p52_p2 = scmp.eq.s32.totalorder %s51_s12, 0 }
  0xb7   : > { %p201_p10 = scmp.ne.s32.totalorder %s1571_s28, %s1567_s27  ;;  %p2215_p11 = scmp.eq.s32.totalorder %s1727_s16, 3 }
  0xb8   : > { %s1913_s26 = scalar_select %p183_p7, %s1575_s29, %s185_s18  }
  0xb9   : > { %s1916_s21 = scalar_select %p52_p2, %s1587_s10, %s54_s22  }
  0xba   : > { %p1920_p12 = por %p2215_p11, %p195_p9  ;;  %p202_p8 = scmp.eq.s32.totalorder %s2187_s7, 3 }
  0xbb   : > { %p1115_p13 = scmp.lt.s32.totalorder %s1607_s15, 4  ;;  %s333_s8 = sand.u32 1, %s1587_s10  }
  0xbc   : > { %s2216_s6 = scalar_select %p1920_p12, 1, 0 }
  0xbd   : > { %p1928_p6 = por %p202_p8, %p201_p10  ;;  %s984_s17 = sshll.u32 %s333_s8, 3 }
  0xbe   : > { %s1015_s30 = sshll.u32 %s48_s19, 7  ;;  %s2218_s25 = sld [smem:[#allocation27_spill]] }
  0xbf   : > { %s2217_s11 = scalar_select %p1928_p6, 1, 0 }
  0xc0   : > { %s337_s1 = scalar_lea.vmem [#allocation2], %s984_s17  ;;  %p1939_p0 = pnand %p1115_p13, %p1894_p1 }
  0xc1   : > { %s346_s2 = sshll.u32 %s337_s1, 4  ;;  %s1945_s19 = scalar_lea.sflag [#allocation3], %s333_s8  ;;  %s1943_s2 = int_to_ptr.vmem [resolvable:$true] %s346_s2 }
  0xc2   : > { %p1385_p4 = pneg %p1939_p0 }
  0xc4   : > { %s1935_s22 = scalar_lea.hbm %s2218_s25, %s1015_s30  ;;  %s1388_s17 = scalar_lea.hbm %s2218_s25, 512 }
  0xc5   : > { %s1383_s12 = scalar_lea.hbm %s1935_s22, 128  ;;  %p1389_p1 = scmp.lt.u32.totalorder %s1935_s22, %s2218_s25 }
  0xc6   : > { %p1384_p3 = scmp.ne.s32.totalorder %s1935_s22, %s1383_s12  ;;  %p1390_p2 = scmp.lt.u32.totalorder %s1388_s17, %s1383_s12 }
  0xc7   : > { %p1392_p11 = scmp.lt.u32.totalorder %s1383_s12, %s1935_s22 }
  0xc8   : > { %p1386_p7 = pnand %p1385_p4, %p1384_p3  ;;  %p1391_p10 = por %p1390_p2, %p1389_p1 }
  0xca   : > { %p1387_p9 = pneg %p1386_p7  ;;  %p1393_p8 = por %p1392_p11, %p1391_p10 }
  0xcc   : > { %p1394_p13 = pnand %p1393_p8, %p1387_p9 }
  0xce   : > { %1397 = shalt.err (!%p1394_p13)
}
  0xcf   : > { %s1398_s8 = scalar_lea.vmem %s1943_s2, 128  ;;  %s1616_s1 = smov [#allocation2]  }
  0xd0   : > { %p1399_p3 = scmp.ne.s32.totalorder %s1943_s2, %s1398_s8  ;;  %s1403_s0 = sshll.u32 %s1616_s1, 4  ;;  %s1404_s0 = int_to_ptr.vmem [resolvable:$false] %s1403_s0 }
  0xd1   : > { %s1405_s30 = scalar_lea.vmem %s1404_s0, 256  ;;  %p1406_p12 = scmp.lt.s32.totalorder %s1943_s2, %s1404_s0 }
  0xd2   : > { %p1401_p7 = pnand %p1399_p3, %p1385_p4  ;;  %p1407_p1 = scmp.lt.s32.totalorder %s1405_s30, %s1398_s8 }
  0xd4   : > { %p1402_p6 = pneg %p1401_p7  ;;  %p1408_p2 = por %p1407_p1, %p1406_p12 }
  0xd6   : > { %p1409_p10 = pnand %p1408_p2, %p1402_p6 }
  0xd8   : > { %1412 = shalt.err (!%p1409_p10)
}
  0xd9   : > { %s2220_s12 = smov 4   ;;  %s2221_s17 = smov 64  }
  0xda   : > { %1099 = dma.hbm_to_vmem [thread:$0]  (!%p1939_p0), %s1935_s22, 128, %s1943_s2, %s1945_s19, %s2221_s17, %s2221_s17, %s2220_s12  }
  0xdb   : > { %s2222_s18 = sld [smem:[#allocation25_spill]] }
  0xe1   : > { %p2223_p4 = scmp.ne.s32.totalorder %s2222_s18, 0 }
  0xe2   : > { %s360_s1 = sand.u32 (!%p2223_p4), 1, %s1583_s9  }
  0xe3   : > { %358 = sbr.rel (%p2223_p4) target bundleno = 1376 (0x560), region = 44  ;;  %s1979_s0 = sshll.u32 (!%p2223_p4), %s360_s1, 3 }
  0xe4   : > { %s361_s8 = scalar_lea.sflag (!%p2223_p4), [#allocation3], %s360_s1  ;;  %s364_s30 = scalar_lea.vmem (!%p2223_p4), [#allocation2], %s1979_s0 }
  0xea   : > { %1542 = dma.done.wait (%p1900_p5), %s361_s8, 128  }
  0xeb   : > { %1544 = vsyncadd (%p1900_p5), %s361_s8, 4294967168  ;;  %p2224_p12 = scmp.eq.s32.totalorder %s1727_s16, 0 }
  0xed   : > { %1546 = dma.done.wait (%p2224_p12), [#allocation6], 528   ;;  %p2225_p6 = pmov %p2224_p12 }
  0xef   : > { %1548 = vsyncadd (%p2225_p6), [#allocation6], 4294966768  ;;  %p2226_p0 = pmov %p2225_p6 }
  0xf1   : > { %1550 = dma.done.wait (%p2226_p0), [#allocation9], 272   ;;  %p2227_p9 = pmov %p2226_p0 }
  0xf2   : > { %p2228_p11 = pmov %p2226_p0 }
  0xf3   : > { %1552 = vsyncadd (%p2227_p9), [#allocation9], 4294967024 }
  0xf4   : > { %1554 = dma.done.wait (%p2228_p11), [#allocation12], 16   ;;  %p2229_p8 = pmov %p2226_p0 }
  0xf5   : > { %s1999_s2 = sand.u32 1, %s1571_s28   ;;  %s2230_s19 = sld [smem:[#allocation23_spill]] }
  0xf6   : > { %1556 = vsyncadd (%p2229_p8), [#allocation12], 4294967280  ;;  %s2002_s7 = scalar_lea.vmem [#allocation13], %s1999_s2  ;;  %s2005_s24 = scalar_lea.vmem [#allocation14], %s1999_s2 }
  0xf7   : > { %s2008_s22 = scalar_lea.vmem [#allocation16], %s1999_s2 }
  0xfb   : > { %p995_p5 = scmp.ne.s32.totalorder %s2230_s19, 0 }
  0xfc   : > { %vm433_vm0 = vcmask (!%p995_p5), 0   ;;  %vm436_vm1 = vcmask (!%p995_p5), 253952   ;;  %v1617_v0 = vmov (!%p995_p5), -1e+30   ;;  %v1618_v1 = vmov (!%p995_p5), 0.0  }
  0xfd   : > { %432 = sbr.rel (%p995_p5) target bundleno = 260 (0x104), region = 72  ;;  %434 = vst.msk [vmem:[%s2002_s7] sm:$0x1] (!%p995_p5), %vm433_vm0, %v1617_v0  ;;  %435 = vst.msk [vmem:[%s2005_s24] sm:$0x1] (!%p995_p5), %vm433_vm0, %v1618_v1 }
  0xfe   : > { %437 = vst.msk [vmem:[%s2008_s22] sm:$0x1] (!%p995_p5), %vm436_vm1, %v1618_v1 }
 0x104 PF: > { %v1224_v2 = vld [vmem:[#allocation5] sm:$0xff]   ;;  %v1619_v3 = vmov 0.0   ;;  %v1225_v4 = vld [vmem:[#allocation5 + $0x8] sm:$0xff]   ;;  %vm1620_vm2 = vmmov 0   ;;  %v1226_v5 = vld [vmem:[#allocation5 + $0x10] sm:$0xff]   ;;  %vm484_vm3 = vcmask 523264   ;;  %v644_v48 = vlaneseq }
 0x105   : > { %1026 = vmatprep.subr.bf16.mxu0 %v1619_v3  ;;  %1038 = vmatprep.subr.bf16.mxu1 %v1619_v3  ;;  %v1227_v6 = vld [vmem:[#allocation5 + $0x18] sm:$0xff]   ;;  %v1229_v8 = vld [vmem:[#allocation8] sm:$0xff]   ;;  %v1230_v9 = vld [vmem:[#allocation8 + $0x8] sm:$0xff]   ;;  %vm555_vm4 = vcmask 261120   ;;  %s1621_s12 = smov 96   ;;  %v1622_v43 = vmov 0  }
 0x106   : > { %1027 = vmatpush3.bf16.msra.mxu0 %v1224_v2  ;;  %1034 = vmatprep.mubr.msk.bf16.mxu0 %vm1620_vm2, %v1619_v3  ;;  %v1228_v7 = vld [vmem:[%s364_s30] sm:$0xff]   ;;  %v996_v10 = vld [vmem:[#allocation7] ss:$0 sm:$0xff]  ;;  %v2022_v51 = vshrl.u32 %v644_v48, 7  ;;  %vm668_vm5 = vcmask 0   ;;  %vm657_vm6 = vcmask 7168  }
 0x107   : > { %1028 = vmatprep.subr.bf16.mxu0 %v1619_v3  ;;  %1042 = vmatprep.mubr.msk.bf16.mxu1 %vm1620_vm2, %v1619_v3  ;;  %v1003_v20 = vld [vmem:[#allocation10] ss:$0 sm:$0xff]  ;;  %v1008_v36 = vld [vmem:[#allocation11] ss:$0 sm:$0xff]  ;;  %v631_v54 = vld [vmem:[%s2002_s7] sm:$0x1] }
 0x108   : > { %1039 = vmatpush3.bf16.msra.mxu1 %v1229_v8  ;;  %1223 = vset.pattern.permute.xlu0 %v1622_v43  ;;  %v646_v55 = vsub.s32 0, %v2022_v51  ;;  %s2231_s17 = sld [smem:[#allocation24_spill]]  ;;  %vm687_vm7 = vcmask 130048   ;;  %s750_s18 = sand.u32 1, %s1727_s16  }
 0x109   : > { %1040 = vmatprep.subr.bf16.mxu1 %v1619_v3  ;;  %s2232_s30 = sld [smem:[#allocation34_spill]]  ;;  %s780_s3 = sshll.u32 %s2005_s24, 4  ;;  %s2044_s3 = int_to_ptr.vmem [resolvable:$true] %s780_s3 }
 0x10a   : > { %1029 = vmatpush3.bf16.msra.mxu0 %v1225_v4  ;;  %s2234_s25 = sld [smem:[#allocation33_spill]]  ;;  %s2052_s16 = scalar_lea.sflag [#allocation15], %s750_s18 }
 0x10b   : > { %1030 = vmatprep.subr.bf16.mxu0 %v1619_v3  ;;  %p2235_p3 = scmp.ne.s32.totalorder %s2216_s6, 0  ;;  %s1623_s0 = smov [#allocation14]  }
 0x10c   : > { %1041 = vmatpush3.bf16.msra.mxu1 %v1230_v9  ;;  %s1417_s8 = sshll.u32 %s1623_s0, 4  ;;  %s1418_s8 = int_to_ptr.vmem [resolvable:$false] %s1417_s8 }
 0x10d   : > { %1046 = vmatprep.subr.bf16.mxu1 %v1619_v3  ;;  %p1420_p2 = scmp.lt.s32.totalorder %s2044_s3, %s1418_s8 }
 0x10e   : > { %1031 = vmatpush3.bf16.msra.mxu0 %v1226_v5  ;;  %s2035_s1 = sshll.u32 %s2231_s17, 4  ;;  %s1413_s17 = scalar_lea.vmem %s2044_s3, 16 }
 0x10f   : > { %1032 = vmatprep.subr.bf16.mxu0 %v1619_v3  ;;  %s2233_s19 = smov %s2232_s30  ;;  %p1414_p13 = scmp.ne.s32.totalorder %s2044_s3, %s1413_s17 }
 0x110   : > { %s2050_s23 = scalar_lea.hbm %s2234_s25, %s2035_s1 }
 0x111   : > { %p1415_p7 = pnand %p1414_p13, %p2235_p3 }
 0x112   : > { %1033 = vmatpush3.bf16.msra.mxu0 %v1227_v6 }
 0x113   : > { %p1416_p1 = pneg %p1415_p7 }
 0x115   : > { %1035 = vmatmul.mubr.msk.bf16.vlgmr.msra.gmra.mrb[0].mxu0 %vm484_vm3, %v1228_v7 }
 0x1e8   : > { %v522_v11 = vpop.f32.mrb[0].mxu0 }
 0x1e9   : > { %v523_v12 = vadd.f32 %v996_v10, %v522_v11  ;;  %v1036_v13 = vpop.f32.mrb[1].mxu0 }
 0x1ea   : > { %v525_v14 = vpop.f32.mrb[2].mxu0 }
 0x1eb   : > { %v526_v15 = vadd.f32 %v996_v10, %v525_v14  ;;  %v1037_v16 = vpop.f32.mrb[3].mxu0  ;;  %v529_v17 = vmax.f32 %v523_v12, 0.0  ;;  %v655_v12 = vld [vmem:[%s2005_s24] sm:$0x1] }
 0x1ed   : > { %v530_v18 = vmax.f32 %v526_v15, 0.0 }
 0x1ef   : > { %v531_v19 = vpack.c.bf16 %v530_v18, %v529_v17 }
 0x1f1   : > { %1043 = vmatmul.mubr.msk.bf16.vlgmr.msra.gmra.mrb[0].mxu1 %vm555_vm4, %v531_v19 }
 0x1f2   : > { %1047 = vmatpush3.bf16.msra.mxu1 %v531_v19  ;;  %1048 = vmatprep.mubr.msk.bf16.mxu1 %vm1620_vm2, %v1619_v3 }
 0x2c4   : > { %v593_v21 = vpop.f32.mrb[0].mxu1 }
 0x2c5   : > { %v1044_v22 = vpop.f32.mrb[1].mxu1  ;;  %v594_v24 = vadd.f32 %v1003_v20, %v593_v21 }
 0x2c6   : > { %v596_v23 = vpop.f32.mrb[2].mxu1 }
 0x2c7   : > { %v597_v25 = vadd.f32 %v1003_v20, %v596_v23  ;;  %v1045_v26 = vpop.f32.mrb[3].mxu1 }
 0x2c9   : > { %v600_v27 = vpack.c.bf16 %v597_v25, %v594_v24 }
 0x2cb   : > { %v1007_v28 = vmul.bf16 3216621497, %v600_v27 }
 0x2cd   : > { %1231 = vpow.bf16 %v1007_v28 }
 0x2d8   : > { %v1232_v29 = vpop.eup %1231 }
 0x2d9   : > { %v606_v30 = vadd.bf16 1065369472, %v1232_v29 }
 0x2db   : > { %1233 = vrcp.bf16 %v606_v30 }
 0x2dc   : > { %1235 = vtanh.bf16 %v600_v27 }
 0x2e6   : > { %v1234_v31 = vpop.eup %1233 }
 0x2e7   : > { %v608_v32 = vmul.bf16 1065369472, %v1234_v31  ;;  %v1236_v33 = vpop.eup %1235 }
 0x2e9   : > { %610 = vrot.lane.b32.xlu0 %v608_v32, %s1621_s12  ;;  %s2041_s12 = scalar_lea.hbm %s2232_s30, %s2035_s1 }
 0x35b   : > { %v611_v34 = vpop.permute.xlu0 %610 }
 0x35c   : > { %v613_v35 = vmul.bf16 %v1236_v33, %v611_v34 }
 0x35e   : > { %v614_v37 = vunpack.c.l.bf16 %v613_v35  ;;  %v615_v38 = vunpack.c.h.bf16 %v613_v35 }
 0x360   : > { %v624_v39 = vmul.f32 %v1008_v36, %v615_v38  ;;  %v623_v40 = vmul.f32 %v1008_v36, %v614_v37 }
 0x362   : > { %v628_v41 = vsel %vm555_vm4, %v624_v39, 0.0  ;;  %v625_v42 = vsel %vm555_vm4, %v623_v40, 0.0 }
 0x363   : > { %629 = vadd.xlane.f32.xlu1 %v628_v41  ;;  %626 = vadd.xlane.f32.xlu0 %v625_v42 }
 0x3f0   : > { %v630_v44 = vpop.xlane.xlu1 %629  ;;  %v627_v45 = vpop.xlane.xlu0 %626 }
 0x3f1   : > { %v632_v46 = vmax.f32 %v627_v45, %v630_v44 }
 0x3f3   : > { %v633_v47 = vrot.slane %v632_v46, 4 }
 0x3f5   : > { %v634_v49 = vmax.f32 %v632_v46, %v633_v47 }
 0x3f7   : > { %v635_v50 = vrot.slane %v634_v49, 2 }
 0x3f9   : > { %v636_v52 = vmax.f32 %v634_v49, %v635_v50 }
 0x3fb   : > { %v637_v53 = vrot.slane %v636_v52, 1 }
 0x3fd   : > { %v638_v56 = vmax.f32 %v636_v52, %v637_v53 }
 0x3ff   : > { %v639_v57 = vmax.f32 %v631_v54, %v638_v56 }
 0x401   : > { %v640_v58 = vsub.f32 %v631_v54, %v639_v57  ;;  %v647_v59 = vrot.slane %v639_v57, %v646_v55  ;;  %745 = vst.msk [vmem:[%s2002_s7] sm:$0x1] %vm668_vm5, %v639_v57 }
 0x403   : > { %v641_v60 = vmul.f32 1.442695, %v640_v58  ;;  %v649_v61 = vsub.f32 %v627_v45, %v647_v59  ;;  %v650_v62 = vsub.f32 %v630_v44, %v647_v59 }
 0x405   : > { %1237 = vpow2.f32 %v641_v60  ;;  %v651_v63 = vmul.f32 1.442695, %v649_v61  ;;  %v653_v0 = vmul.f32 1.442695, %v650_v62 }
 0x407   : > { %1239 = vpow2.f32 %v651_v63 }
 0x408   : > { %1241 = vpow2.f32 %v653_v0 }
 0x40f   : > { %v1238_v1 = vpop.eup %1237 }
 0x410   : > { %734 = vperm.xlu0 %1223, %v1238_v1   ;;  %v656_v14 = vmul.f32 %v1238_v1, %v655_v12 }
 0x411   : > { %v1240_v2 = vpop.eup %1239 }
 0x412   : > { %v1242_v3 = vpop.eup %1241  ;;  %v658_v4 = vsel %vm657_vm6, %v1240_v2, 0.0 }
 0x413   : > { %v659_v5 = vsel %vm657_vm6, %v1242_v3, 0.0  ;;  %v670_v6 = vpack.c.bf16 %v1242_v3, %v1240_v2 }
 0x414   : > { %v660_v7 = vadd.f32 %v659_v5, %v658_v4 }
 0x415   : > { %671 = vxpose.xlu1.c.b16.start.end [1/1] (short) (narrow) %v670_v6, 16 }
 0x416   : > { %v661_v8 = vrot.slane %v660_v7, 4 }
 0x418   : > { %v662_v9 = vadd.f32 %v661_v8, %v660_v7 }
 0x41a   : > { %v663_v10 = vrot.slane %v662_v9, 2 }
 0x41c   : > { %v664_v11 = vadd.f32 %v663_v10, %v662_v9 }
 0x41e   : > { %v665_v13 = vrot.slane %v664_v11, 1 }
 0x420   : > { %v666_v15 = vadd.f32 %v665_v13, %v664_v11 }
 0x422   : > { %v667_v16 = vadd.f32 %v666_v15, %v656_v14 }
 0x424   : > { %669 = vst.msk [vmem:[%s2005_s24] sm:$0x1] %vm668_vm5, %v667_v16  ;;  %s1419_s24 = scalar_lea.vmem %s1418_s8, 32 }
 0x425   : > { %p1421_p10 = scmp.lt.s32.totalorder %s1419_s24, %s1413_s17 }
 0x427   : > { %p1422_p4 = por %p1421_p10, %p1420_p2 }
 0x429   : > { %p1423_p12 = pnand %p1422_p4, %p1416_p1 }
 0x47b   : > { %v679_v17 = vpop.trf.xlu1 }
 0x47c   : > { %1049 = vmatmul.mubr.msk.bf16.vlgmr.msra.gmra.mrb[4].mxu1 %vm687_vm7, %v679_v17 }
 0x47d   : > { %1426 = shalt.err (!%p1423_p12)
}
 0x47e   : > { %s1427_s4 = scalar_lea.hbm %s2041_s12, 16  ;;  %s1431_s30 = scalar_lea.hbm %s2233_s19, 32 }
 0x47f   : > { %p1428_p6 = scmp.ne.s32.totalorder %s2041_s12, %s1427_s4  ;;  %p1432_p11 = scmp.lt.u32.totalorder %s2041_s12, %s2233_s19 }
 0x480   : > { %p1433_p8 = scmp.lt.u32.totalorder %s1431_s30, %s1427_s4  ;;  %p1435_p13 = scmp.lt.u32.totalorder %s1427_s4, %s2041_s12 }
 0x481   : > { %p1429_p0 = pnand %p1428_p6, %p2235_p3 }
 0x482   : > { %p1434_p5 = por %p1433_p8, %p1432_p11 }
 0x483   : > { %p1430_p9 = pneg %p1429_p0 }
 0x484   : > { %p1436_p7 = por %p1435_p13, %p1434_p5 }
 0x486   : > { %p1437_p1 = pnand %p1436_p7, %p1430_p9 }
 0x488   : > { %1440 = shalt.err (!%p1437_p1)
}
 0x489   : > { %1075 = dma.vmem_to_hbm [thread:$0]  (%p2235_p3), %s2044_s3, 16, %s2041_s12, %s2052_s16  }
 0x48a   : > { %s767_s17 = sshll.u32 %s2002_s7, 4  ;;  %s747_s24 = scalar_lea.sflag [#allocation4], %s1999_s2  ;;  %s768_s17 = int_to_ptr.vmem [resolvable:$true] %s767_s17 }
 0x48b   : > { %s1441_s5 = scalar_lea.vmem %s768_s17, 16  ;;  %s1624_s4 = smov [#allocation13]  }
 0x48c   : > { %p1442_p2 = scmp.ne.s32.totalorder %s768_s17, %s1441_s5  ;;  %s1445_s18 = sshll.u32 %s1624_s4, 4  ;;  %s1446_s18 = int_to_ptr.vmem [resolvable:$false] %s1445_s18 }
 0x48d   : > { %s1447_s30 = scalar_lea.vmem %s1446_s18, 32  ;;  %p1448_p12 = scmp.lt.s32.totalorder %s768_s17, %s1446_s18 }
 0x48e   : > { %p1443_p10 = pnand %p1442_p2, %p2235_p3  ;;  %p1449_p6 = scmp.lt.s32.totalorder %s1447_s30, %s1441_s5 }
 0x490   : > { %p1444_p4 = pneg %p1443_p10  ;;  %p1450_p0 = por %p1449_p6, %p1448_p12 }
 0x492   : > { %p1451_p9 = pnand %p1450_p0, %p1444_p4 }
 0x494   : > { %1454 = shalt.err (!%p1451_p9)
}
 0x495   : > { %s1455_s3 = scalar_lea.hbm %s2050_s23, 16  ;;  %s1459_s12 = scalar_lea.hbm %s2234_s25, 32 }
 0x496   : > { %p1456_p11 = scmp.ne.s32.totalorder %s2050_s23, %s1455_s3  ;;  %p1460_p13 = scmp.lt.u32.totalorder %s2050_s23, %s2234_s25 }
 0x497   : > { %p1461_p7 = scmp.lt.u32.totalorder %s1459_s12, %s1455_s3  ;;  %p1463_p2 = scmp.lt.u32.totalorder %s1455_s3, %s2050_s23 }
 0x498   : > { %p1457_p8 = pnand %p1456_p11, %p2235_p3 }
 0x499   : > { %p1462_p1 = por %p1461_p7, %p1460_p13 }
 0x49a   : > { %p1458_p5 = pneg %p1457_p8 }
 0x49b   : > { %p1464_p10 = por %p1463_p2, %p1462_p1 }
 0x49d   : > { %p1465_p4 = pnand %p1464_p10, %p1458_p5 }
 0x49f   : > { %1468 = shalt.err (!%p1465_p4)
}
 0x4a0   : > { %1074 = dma.vmem_to_hbm [thread:$0]  (%p2235_p3), %s768_s17, 16, %s2050_s23, %s747_s24   ;;  %v735_v18 = vpop.permute.xlu0 %734  ;;  %v731_v20 = vld [vmem:[%s2008_s22] sm:$0x1]  ;;  %vm743_vm8 = vcmask 253952  }
 0x4a1   : > { %v740_v19 = vrot.slane %v735_v18, %v646_v55  ;;  %s793_s5 = sshll.u32 %s2008_s22, 4  ;;  %s2236_s30 = sld [smem:[#allocation35_spill]]  ;;  %s2105_s5 = int_to_ptr.vmem [resolvable:$true] %s793_s5 }
 0x4a2   : > { %s1469_s23 = scalar_lea.vmem %s2105_s5, 16  ;;  %s1625_s17 = smov [#allocation16]  }
 0x4a3   : > { %v741_v21 = vmul.f32 %v740_v19, %v731_v20  ;;  %p1470_p12 = scmp.ne.s32.totalorder %s2105_s5, %s1469_s23  ;;  %s1473_s24 = sshll.u32 %s1625_s17, 4  ;;  %s1474_s24 = int_to_ptr.vmem [resolvable:$false] %s1473_s24 }
 0x4a4   : > { %s1475_s7 = scalar_lea.vmem %s1474_s24, 32  ;;  %p1476_p9 = scmp.lt.s32.totalorder %s2105_s5, %s1474_s24 }
 0x4a5   : > { %p1471_p6 = pnand %p1470_p12, %p2235_p3  ;;  %p1477_p11 = scmp.lt.s32.totalorder %s1475_s7, %s1469_s23 }
 0x4a7   : > { %s2237_s3 = smov %s2236_s30  ;;  %s2103_s2 = scalar_lea.hbm %s2236_s30, %s2035_s1 }
 0x4a8   : > { %p1472_p0 = pneg %p1471_p6  ;;  %p1478_p8 = por %p1477_p11, %p1476_p9 }
 0x4aa   : > { %p1479_p5 = pnand %p1478_p8, %p1472_p0 }
 0x54f   : > { %v725_v22 = vpop.f32.mrb[4].mxu1 }
 0x550   : > { %v742_v23 = vadd.f32 %v741_v21, %v725_v22  ;;  %v1050_v24 = vpop.f32.mrb[5].mxu1 }
 0x551   : > { %v728_v25 = vpop.f32.mrb[6].mxu1 }
 0x552   : > { %744 = vst.msk [vmem:[%s2008_s22] sm:$0x1] %vm743_vm8, %v742_v23  ;;  %v1051_v26 = vpop.f32.mrb[7].mxu1 }
 0x553   : > { %1482 = shalt.err (!%p1479_p5)
}
 0x554   : > { %s1483_s22 = scalar_lea.hbm %s2103_s2, 16  ;;  %s1487_s0 = scalar_lea.hbm %s2237_s3, 32 }
 0x555   : > { %p1484_p13 = scmp.ne.s32.totalorder %s2103_s2, %s1483_s22  ;;  %p1488_p2 = scmp.lt.u32.totalorder %s2103_s2, %s2237_s3 }
 0x556   : > { %p1489_p10 = scmp.lt.u32.totalorder %s1487_s0, %s1483_s22  ;;  %p1491_p12 = scmp.lt.u32.totalorder %s1483_s22, %s2103_s2 }
 0x557   : > { %p1485_p7 = pnand %p1484_p13, %p2235_p3 }
 0x558   : > { %p1490_p4 = por %p1489_p10, %p1488_p2 }
 0x559   : > { %p1486_p1 = pneg %p1485_p7 }
 0x55a   : > { %p1492_p6 = por %p1491_p12, %p1490_p4 }
 0x55c   : > { %p1493_p0 = pnand %p1492_p6, %p1486_p1 }
 0x55e   : > { %1496 = shalt.err (!%p1493_p0)
}
 0x55f   : > { %1076 = dma.vmem_to_hbm [thread:$0]  (%p2235_p3), %s2105_s5, 16, %s2103_s2, %s2052_s16  }
 0x560 PF: > { %p1121_p9 = scmp.ge.s32.totalorder %s1607_s15, 2  ;;  %s805_s18 = sand.u32 1, %s1567_s27  }
 0x561   : > { %p2238_p11 = scmp.ne.s32.totalorder %s2217_s11, 0  ;;  %s806_s30 = scalar_lea.sflag [#allocation4], %s805_s18 }
 0x563   : > { %p1101_p8 = pnand %p1121_p9, %p2238_p11 }
 0x565   : > { %1558 = dma.done.wait (!%p1101_p8), %s806_s30, 16  }
 0x566   : > { %1560 = vsyncadd (!%p1101_p8), %s806_s30, 4294967280  ;;  %s2239_s23 = sadd.s32 4294967294, %s1607_s15  }
 0x567   : > { %s813_s17 = sand.u32 1, %s2239_s23  }
 0x568   : > { %s814_s24 = scalar_lea.sflag [#allocation15], %s813_s17 }
 0x569   : > { %1562 = dma.done.wait (!%p1101_p8), %s814_s24, 32  }
 0x56a   : > { %1564 = vsyncadd (!%p1101_p8), %s814_s24, 4294967264  ;;  %s31_s15 = sadd.s32 1, %s1607_s15   ;;  %s2240_s6 = sld [smem:[#allocation26_spill]] }
 0x56b   : > { %p28_p3 = scmp.ge.s32.totalorder %s31_s15, 6   ;;  %s2241_s27 = smov %s1571_s28 }
 0x56c   : > { %s2242_s28 = smov %s1575_s29  ;;  %s2243_s29 = smov %s1913_s26 }
 0x56d   : > { %s2244_s30 = smov %s1583_s9  ;;  %s2245_s9 = smov %s1587_s10 }
 0x56e   : > { %s2246_s10 = smov %s1916_s21  ;;  %s2247_s11 = smov %s1599_s13 }
 0x56f   : > { %s2248_s12 = smov %s1603_s14  ;;  %s2249_s13 = smov %s2252_s20 }
 0x570   : > { %s2250_s14 = smov %s2240_s6  ;;  %30 = sbr.rel (!%p28_p3) target bundleno = 24 (0x18), region = 145 }
 0x577   :  { %826 = vsyncpa [#allocation3], 1 }
 0x578   :  { %828 = vsyncpa [#allocation3 + $0x1], 1 }
 0x579   :  { %829 = vsyncpa [#allocation6], 1 }
 0x57a   :  { %830 = vsyncpa [#allocation9], 1 }
 0x57b   :  { %831 = vsyncpa [#allocation12], 1 }
 0x57c   :  { %832 = vsyncpa [#allocation4], 1 }
 0x57d   :  { %834 = vsyncpa [#allocation4 + $0x1], 1 }
 0x57e   :  { %835 = vsyncpa [#allocation15], 1 }
 0x57f   :  { %837 = vsyncpa [#allocation15 + $0x1], 1 }

</bundles_post_ra>
